<compile_context>
chip_gen: v7x
topology: tpu7x:2x2x1
jax: 0.10.0
libtpu: 0.0.40
codegen_flags: <defaults>
</compile_context>

<pallas_src>
import numpy as np
import jax
import jax.numpy as jnp
from jax.experimental import pallas as pl
from jax.experimental.pallas import tpu as pltpu


# ----------------------------- blur-matrix construction -----------------------------

def _gaussian_kernel_1d(ksize: int, sigma: float) -> np.ndarray:
    """Matches kornia get_gaussian_kernel1d: normalized 1D gaussian."""
    x = np.arange(ksize, dtype=np.float64) - (ksize - 1) / 2.0
    g = np.exp(-(x ** 2) / (2.0 * sigma ** 2))
    return g / g.sum()


def _reflect_idx(j: int, n: int) -> int:
    """'reflect' (no edge repeat) index mapping, valid for |overhang| < n."""
    if j < 0:
        return -j
    if j >= n:
        return 2 * (n - 1) - j
    return j


def _blur_matrix(n: int, g: np.ndarray) -> np.ndarray:
    """(n, n) banded matrix M such that (M @ x) blurs along x's leading axis with
    'reflect' padding; the boundary handling is folded into the edge rows."""
    k = len(g)
    pad = k // 2
    M = np.zeros((n, n), dtype=np.float64)
    for i in range(n):
        for t in range(k):
            M[i, _reflect_idx(i - pad + t, n)] += g[t]
    return M.astype(np.float32)


# ------------------------------------ kernel ----------------------------------------

def _blur_kernel(a_ref, b_ref, x_ref, o_ref):
    # a_ref: (H, H)  vertical blur matrix (reflect folded in), f32, VMEM-resident
    # b_ref: (W, W)  horizontal blur matrix (transposed so row-vec @ B blurs along W)
    # x_ref: (Pb, H, W) input block of whole planes
    # o_ref: (Pb, H, W) output block
    pb = x_ref.shape[0]
    xf = x_ref[...].astype(jnp.float32)

    a = jnp.broadcast_to(a_ref[...], (pb,) + a_ref.shape)   # (Pb, H, H)
    b = jnp.broadcast_to(b_ref[...], (pb,) + b_ref.shape)   # (Pb, W, W)

    # Horizontal pass on the MXU: t[p,h,k] = sum_w x[p,h,w] * B[w,k]
    t = jnp.einsum('phw,pwk->phk', xf, b, preferred_element_type=jnp.float32)
    # Vertical pass on the MXU:   o[p,h,w] = sum_j A[h,j] * t[p,j,w]
    out = jnp.einsum('phj,pjw->phw', a, t, preferred_element_type=jnp.float32)

    o_ref[...] = out.astype(o_ref.dtype)


# ------------------------------------ wrapper ----------------------------------------

def gaussian_blur2d(image: jax.Array, sigma: float, ksize: int = 7) -> jax.Array:
    """Depthwise KxK gaussian blur, reflect padding, NCHW -> NCHW."""
    N, C, H, W = image.shape
    assert ksize % 2 == 1, "odd kernel size required"
    pad = ksize // 2
    assert H > pad and W > pad, "reflect padding requires H, W > kernel//2"

    g = _gaussian_kernel_1d(ksize, float(sigma))
    A = jnp.asarray(_blur_matrix(H, g))          # vertical:   A @ X
    B = jnp.asarray(_blur_matrix(W, g).T)        # horizontal: X @ B

    P = N * C
    x = image.reshape(P, H, W)
    isize = int(jnp.dtype(image.dtype).itemsize)

    # ---- generation-aware VMEM budgeting (128 MiB v5e/v6e, 64 MiB per-TC v7x) ----
    try:
        vmem_cap = int(getattr(pltpu.get_tpu_info(), "vmem_capacity_bytes",
                               128 * 1024 * 1024))
    except Exception:  # pragma: no cover - hardware query unavailable
        vmem_cap = 128 * 1024 * 1024
    budget = int(vmem_cap * 0.45)                              # block data + intermediates
    vmem_limit = max(32 * 1024 * 1024,
                     min(int(vmem_cap * 0.75), vmem_cap - (4 << 20)))

    # Fixed VMEM: resident A/B (double-buffered).  Per-plane: in+out blocks
    # (double-buffered), f32 intermediates, and the per-plane broadcast of A/B
    # consumed by the batched matmuls.
    fixed = (H * H + W * W) * 4 * 2
    per_plane = H * W * (4 * isize + 12) + (H * H + W * W) * 4
    pb_cap = max(1, (budget - fixed) // per_plane)

    # Keep >= 2 grid steps so the v7x megacore ("parallel" axis) has work, but only
    # when the resulting blocks stay >= 2 MiB (so the ~0.35us/step overhead and
    # smaller DMAs are negligible).  On v5e/v6e single-TC chips this never forces
    # tiny blocks.
    if P >= 2:
        half = (P + 1) // 2
        if half * H * W * isize >= (2 << 20):
            pb_cap = min(pb_cap, half)

    Pb = int(min(P, pb_cap))
    grid = (pl.cdiv(P, Pb),)                     # ragged last block is masked by Pallas

    out = pl.pallas_call(
        _blur_kernel,
        out_shape=jax.ShapeDtypeStruct((P, H, W), image.dtype),
        grid=grid,
        in_specs=[
            pl.BlockSpec((H, H), lambda p: (0, 0)),       # A: VMEM-resident
            pl.BlockSpec((W, W), lambda p: (0, 0)),       # B: VMEM-resident
            pl.BlockSpec((Pb, H, W), lambda p: (p, 0, 0)),
        ],
        out_specs=pl.BlockSpec((Pb, H, W), lambda p: (p, 0, 0)),
        compiler_params=pltpu.CompilerParams(
            dimension_semantics=("parallel",),
            vmem_limit_bytes=int(vmem_limit),
        ),
    )(A, B, x)
    return out.reshape(N, C, H, W)


class GF:
    """JAX/Pallas equivalent of the PyTorch GF module."""

    def __init__(self, sigma: float, kernel: int = 7):
        self.sigma = float(sigma)
        self.kernel = int(kernel)

    def __call__(self, image_and_cover):
        image, cover_image = image_and_cover   # cover_image unused, as in PyTorch
        return gaussian_blur2d(image, self.sigma, self.kernel)


# ---------------------------------- reference ----------------------------------------

def _reference_blur(image, sigma, ksize):
    """Pure-JAX reference: full 2D KxK weighted sum with reflect padding."""
    g = _gaussian_kernel_1d(ksize, sigma)
    k2 = np.outer(g, g).astype(np.float32)
    pad = ksize // 2
    H, W = image.shape[-2:]
    xp = jnp.pad(image.astype(jnp.float32),
                 ((0, 0), (0, 0), (pad, pad), (pad, pad)), mode="reflect")
    acc = jnp.zeros(image.shape, jnp.float32)
    for i in range(ksize):
        for j in range(ksize):
            acc = acc + k2[i, j] * xp[..., i:i + H, j:j + W]
    return acc.astype(image.dtype)


if __name__ == "__main__":
    key = jax.random.PRNGKey(0)
    k1, k2 = jax.random.split(key)
    image = jax.random.normal(k1, (2, 4, 16, 16), dtype=jnp.float32)
    cover = jax.random.normal(k2, (2, 4, 16, 16), dtype=jnp.float32)

    gf = GF(sigma=1.5, kernel=7)
    out = jax.block_until_ready(gf((image, cover)))

    assert out.shape == image.shape and out.dtype == image.dtype
    ref = jax.block_until_ready(_reference_blur(image, 1.5, 7))
    # f32 accumulation; tolerance leaves margin for MXU matmul rounding.
    np.testing.assert_allclose(np.asarray(out), np.asarray(ref), rtol=2e-3, atol=2e-3)
    print("KERNEL_OK")
</pallas_src>

<mosaic_0001>
module attributes {stable_mosaic.version = 11 : i64} {
  func.func @_blur_kernel(%arg0: i32, %arg1: memref<16x16xf32, #tpu.memory_space<vmem>>, %arg2: memref<16x16xf32, #tpu.memory_space<vmem>>, %arg3: memref<8x16x16xf32, #tpu.memory_space<vmem>>, %arg4: memref<8x16x16xf32, #tpu.memory_space<vmem>>) attributes {dimension_semantics = [#tpu.dimension_semantics<parallel>], iteration_bounds = array<i64: 1>, scalar_prefetch = 0 : i64, scratch_operands = 0 : i64, tpu.core_type = #tpu.core_type<tc>, window_params = [{pipeline_mode = #tpu.pipeline_mode<synchronous>, transform_indices = @transform_0, window_bounds = array<i64: 16, 16>}, {pipeline_mode = #tpu.pipeline_mode<synchronous>, transform_indices = @transform_1, window_bounds = array<i64: 16, 16>}, {transform_indices = @transform_2, window_bounds = array<i64: 8, 16, 16>}, {transform_indices = @transform_3, window_bounds = array<i64: 8, 16, 16>}]} {
    %c0 = arith.constant 0 : index
    %c0_0 = arith.constant 0 : index
    %c0_1 = arith.constant 0 : index
    %0 = vector.load %arg3[%c0, %c0_0, %c0_1] : memref<8x16x16xf32, #tpu.memory_space<vmem>>, vector<8x16x16xf32>
    %c0_2 = arith.constant 0 : index
    %c0_3 = arith.constant 0 : index
    %1 = vector.load %arg1[%c0_2, %c0_3] : memref<16x16xf32, #tpu.memory_space<vmem>>, vector<16x16xf32>
    %2 = vector.shape_cast %1 : vector<16x16xf32> to vector<1x16x16xf32>
    %3 = vector.broadcast %2 : vector<1x16x16xf32> to vector<8x16x16xf32>
    %c0_4 = arith.constant 0 : index
    %c0_5 = arith.constant 0 : index
    %4 = vector.load %arg2[%c0_4, %c0_5] : memref<16x16xf32, #tpu.memory_space<vmem>>, vector<16x16xf32>
    %5 = vector.shape_cast %4 : vector<16x16xf32> to vector<1x16x16xf32>
    %6 = vector.broadcast %5 : vector<1x16x16xf32> to vector<8x16x16xf32>
    "tpu.trace_start"() <{level = 10 : i32, message = "phw,pwk->phk"}> : () -> ()
    %cst = arith.constant dense<0.000000e+00> : vector<8x16x16xf32>
    %7 = tpu.matmul %0, %6, %cst {dimension_numbers = #tpu.dot_dimension_numbers<[2], [1], [1], [2], [0, 0, 0, 1, 1, 2], [0], [0]>} : vector<8x16x16xf32>, vector<8x16x16xf32>, vector<8x16x16xf32> -> vector<8x16x16xf32>
    "tpu.trace_stop"() : () -> ()
    "tpu.trace_start"() <{level = 10 : i32, message = "phj,pjw->phw"}> : () -> ()
    %cst_6 = arith.constant dense<0.000000e+00> : vector<8x16x16xf32>
    %8 = tpu.matmul %3, %7, %cst_6 {dimension_numbers = #tpu.dot_dimension_numbers<[2], [1], [1], [2], [0, 0, 0, 1, 1, 2], [0], [0]>} : vector<8x16x16xf32>, vector<8x16x16xf32>, vector<8x16x16xf32> -> vector<8x16x16xf32>
    "tpu.trace_stop"() : () -> ()
    %c0_7 = arith.constant 0 : index
    %c0_8 = arith.constant 0 : index
    %c0_9 = arith.constant 0 : index
    %9 = vector.load %arg4[%c0_7, %c0_8, %c0_9] : memref<8x16x16xf32, #tpu.memory_space<vmem>>, vector<8x16x16xf32>
    tpu.vector_store %arg4[%c0_7, %c0_8, %c0_9], %8 {strides = array<i32>} : memref<8x16x16xf32, #tpu.memory_space<vmem>>, vector<8x16x16xf32>,
    return
  }
  func.func @transform_0(%arg0: i32) -> (i32, i32) {
    %c0_i32 = arith.constant 0 : i32
    %c0_i32_0 = arith.constant 0 : i32
    %c0_i32_1 = arith.constant 0 : i32
    return %c0_i32, %c0_i32_0 : i32, i32
  }
  func.func @transform_1(%arg0: i32) -> (i32, i32) {
    %c0_i32 = arith.constant 0 : i32
    %c0_i32_0 = arith.constant 0 : i32
    %c0_i32_1 = arith.constant 0 : i32
    return %c0_i32, %c0_i32_0 : i32, i32
  }
  func.func @transform_2(%arg0: i32) -> (i32, i32, i32) {
    %c0_i32 = arith.constant 0 : i32
    %c0_i32_0 = arith.constant 0 : i32
    %c0_i32_1 = arith.constant 0 : i32
    return %arg0, %c0_i32, %c0_i32_0 : i32, i32, i32
  }
  func.func @transform_3(%arg0: i32) -> (i32, i32, i32) {
    %c0_i32 = arith.constant 0 : i32
    %c0_i32_0 = arith.constant 0 : i32
    %c0_i32_1 = arith.constant 0 : i32
    return %arg0, %c0_i32, %c0_i32_0 : i32, i32, i32
  }
}

</mosaic_0001>

<bundles_post_ra>
// kernel: tpu_custom_call.1
= control target key start
LH: loop header
LB: loop body
LE: loop exit
PB: predicated region body
PF: predicated region fallthrough
CT: control target
= control target key end

     0   :  { %8 = vsyncpa [#allocation3], 0  ;;  %s1878_s0 = inlined_call_operand.hbm [shape: f32[16,16], index: 0, kind: input, shape index: {}]   ;;  %s1879_s1 = inlined_call_operand.hbm [shape: f32[16,16], index: 1, kind: input, shape index: {}]   ;;  %s1880_s2 = inlined_call_operand.hbm [shape: f32[8,16,16], index: 2, kind: input, shape index: {}]   ;;  %s1881_s3 = inlined_call_operand.hbm [shape: f32[8,16,16], index: 3, kind: output, shape index: {}]  }
   0x1   :  { %9 = vsyncpa [#allocation6], 0 }
   0x2   :  { %10 = vsyncpa [#allocation4], 0  ;;  %s1737_s12 = smov [#allocation5]   ;;  %s1738_s14 = smov [#allocation2]  }
   0x3   :  { %s28_s13 = sshll.u32 %s1737_s12, 4  ;;  %s16_s15 = sshll.u32 %s1738_s14, 4  ;;  %s29_s13 = int_to_ptr.vmem [resolvable:$true] %s28_s13  ;;  %s1763_s15 = int_to_ptr.vmem [resolvable:$true] %s16_s15 }
   0x4   :  { %s1643_s18 = scalar_lea.hbm %s1879_s1, 256 }
   0x5   :  { %p1644_p0 = scmp.ne.s32.totalorder %s1879_s1, %s1643_s18  ;;  %p1647_p1 = scmp.lt.u32.totalorder %s1643_s18, %s1879_s1 }
   0x7   :  { %p1649_p2 = pnand %p1647_p1, %p1644_p0 }
   0x9   :  { %1652 = shalt.err (!%p1649_p2)
}
   0xa   :  { %s1653_s23 = scalar_lea.vmem %s29_s13, 256  ;;  %p1658_p4 = scmp.lt.s32.totalorder %s29_s13, %s29_s13 }
   0xb   :  { %p1654_p3 = scmp.ne.s32.totalorder %s29_s13, %s1653_s23  ;;  %p1659_p5 = scmp.lt.s32.totalorder %s1653_s23, %s1653_s23 }
   0xd   :  { %p1660_p6 = por %p1659_p5, %p1658_p4 }
   0xf   :  { %p1661_p7 = pnand %p1660_p6, %p1654_p3 }
  0x11   :  { %1664 = shalt.err (!%p1661_p7)
}
  0x12   :  { %s1739_s24 = smov 128   ;;  %s1740_s25 = smov 8  }
  0x13   :  { %34 = dma.hbm_to_vmem [thread:$0]  %s1879_s1, 256, %s29_s13, [#allocation6], %s1739_s24, %s1739_s24, %s1740_s25  }
  0x14   :  { %s1665_s30 = scalar_lea.hbm %s1878_s0, 256 }
  0x15   :  { %p1666_p8 = scmp.ne.s32.totalorder %s1878_s0, %s1665_s30  ;;  %p1669_p9 = scmp.lt.u32.totalorder %s1665_s30, %s1878_s0 }
  0x17   :  { %p1671_p10 = pnand %p1669_p9, %p1666_p8 }
  0x19   :  { %1674 = shalt.err (!%p1671_p10)
}
  0x1a   :  { %s1675_s8 = scalar_lea.vmem %s1763_s15, 256  ;;  %p1680_p12 = scmp.lt.s32.totalorder %s1763_s15, %s1763_s15 }
  0x1b   :  { %p1676_p11 = scmp.ne.s32.totalorder %s1763_s15, %s1675_s8  ;;  %p1681_p13 = scmp.lt.s32.totalorder %s1675_s8, %s1675_s8 }
  0x1d   :  { %p1682_p0 = por %p1681_p13, %p1680_p12 }
  0x1f   :  { %p1683_p1 = pnand %p1682_p0, %p1676_p11 }
  0x21   :  { %1686 = shalt.err (!%p1683_p1)
}
  0x22   :  { %22 = dma.hbm_to_vmem [thread:$0]  %s1878_s0, 256, %s1763_s15, [#allocation3], %s1739_s24, %s1739_s24, %s1740_s25  }
  0x23   :  { %s1741_s10 = smov [#allocation7]   ;;  %s1687_s14 = scalar_lea.hbm %s1880_s2, 2048 }
  0x24   :  { %s40_s11 = sshll.u32 %s1741_s10, 4  ;;  %p1688_p2 = scmp.ne.s32.totalorder %s1880_s2, %s1687_s14  ;;  %s41_s11 = int_to_ptr.vmem [resolvable:$true] %s40_s11 }
  0x25   :  { %p1691_p3 = scmp.lt.u32.totalorder %s1687_s14, %s1880_s2 }
  0x27   :  { %p1693_p4 = pnand %p1691_p3, %p1688_p2 }
  0x29   :  { %1696 = shalt.err (!%p1693_p4)
}
  0x2a   :  { %s1697_s20 = scalar_lea.vmem %s41_s11, 2048  ;;  %p1702_p6 = scmp.lt.s32.totalorder %s41_s11, %s41_s11 }
  0x2b   :  { %p1698_p5 = scmp.ne.s32.totalorder %s41_s11, %s1697_s20  ;;  %p1703_p7 = scmp.lt.s32.totalorder %s1697_s20, %s1697_s20 }
  0x2d   :  { %p1704_p8 = por %p1703_p7, %p1702_p6 }
  0x2f   :  { %p1705_p9 = pnand %p1704_p8, %p1698_p5 }
  0x31   :  { %1708 = shalt.err (!%p1705_p9)
}
  0x32   :  { %46 = dma.hbm_to_vmem [thread:$0]  %s1880_s2, 2048, %s41_s11, [#allocation6], %s1739_s24, %s1739_s24, %s1740_s25  }
  0x33   :  { %1731 = dma.done.wait [#allocation3], 256  }
  0x34   :  { %1732 = vsyncadd [#allocation3], 4294967040 }
  0x35   :  { %1733 = dma.done.wait [#allocation6], 2304  }
  0x36   :  { %1734 = vsyncadd [#allocation6], 4294964992  ;;  %vm76_vm0 = vcmask 130048   ;;  %v74_v0 = vld [vmem:[#allocation5] sm:$0xff]  ;;  %v75_v1 = vld [vmem:[#allocation5 + $0x8] sm:$0xff]  ;;  %s1742_s2 = smov [#allocation8]  }
  0x37   :  { %v56_v2 = vld [vmem:[#allocation7] sm:$0xff]  ;;  %v1573_v3 = vpack.c.bf16 %v75_v1, %v74_v0  ;;  %v58_v4 = vld [vmem:[#allocation7 + $0x10] sm:$0xff]  ;;  %v57_v5 = vld [vmem:[#allocation7 + $0x8] sm:$0xff]  ;;  %s1352_s21 = sshll.u32 %s1742_s2, 4  ;;  %s1353_s21 = int_to_ptr.vmem [resolvable:$true] %s1352_s21 }
  0x38   :  { %1465 = vmatprep.mubr.msk.f32.mxu0 %vm76_vm0, %v56_v2  ;;  %1472 = vmatprep.mubr.msk.f32.mxu1 %vm76_vm0, %v58_v4  ;;  %v59_v6 = vld [vmem:[#allocation7 + $0x18] sm:$0xff]  ;;  %v60_v7 = vld [vmem:[#allocation7 + $0x20] sm:$0xff]  ;;  %v62_v8 = vld [vmem:[#allocation7 + $0x30] sm:$0xff]  ;;  %s1709_s22 = scalar_lea.vmem %s1353_s21, 2048  ;;  %p1714_p11 = scmp.lt.s32.totalorder %s1353_s21, %s1353_s21 }
  0x39   :  { %1574 = vmatprep.subr.bf16.mxu0 %v1573_v3  ;;  %1578 = vmatprep.subr.bf16.mxu1 %v1573_v3  ;;  %v61_v9 = vld [vmem:[#allocation7 + $0x28] sm:$0xff]  ;;  %v63_v10 = vld [vmem:[#allocation7 + $0x38] sm:$0xff]  ;;  %v64_v11 = vld [vmem:[#allocation7 + $0x40] sm:$0xff]  ;;  %p1710_p10 = scmp.ne.s32.totalorder %s1353_s21, %s1709_s22  ;;  %p1715_p12 = scmp.lt.s32.totalorder %s1709_s22, %s1709_s22 }
  0x3a   :  { %1576 = vmatpush3.bf16.msra.mxu0 %v1573_v3  ;;  %1580 = vmatpush3.bf16.msra.mxu1 %v1573_v3  ;;  %v66_v12 = vld [vmem:[#allocation7 + $0x50] sm:$0xff]  ;;  %v65_v13 = vld [vmem:[#allocation7 + $0x48] sm:$0xff]  ;;  %v67_v14 = vld [vmem:[#allocation7 + $0x58] sm:$0xff] }
  0x3b   :  { %1582 = vmatprep.subr.bf16.mxu0 %v1573_v3  ;;  %1586 = vmatprep.subr.bf16.mxu1 %v1573_v3  ;;  %v68_v15 = vld [vmem:[#allocation7 + $0x60] sm:$0xff]  ;;  %v70_v16 = vld [vmem:[#allocation7 + $0x70] sm:$0xff]  ;;  %v69_v17 = vld [vmem:[#allocation7 + $0x68] sm:$0xff]  ;;  %p1716_p13 = por %p1715_p12, %p1714_p11 }
  0x3c   :  { %v71_v18 = vld [vmem:[#allocation7 + $0x78] sm:$0xff]  ;;  %v72_v19 = vld [vmem:[#allocation2] sm:$0xff]  ;;  %v73_v30 = vld [vmem:[#allocation2 + $0x8] sm:$0xff] }
  0x3d   :  { %1466 = vmatmul.mubr.msk.f32.vlgmr.msra.gmra.mrb[0].mxu0 %vm76_vm0, %v57_v5  ;;  %1473 = vmatmul.mubr.msk.f32.vlgmr.msra.gmra.mrb[0].mxu1 %vm76_vm0, %v59_v6  ;;  %p1717_p0 = pnand %p1716_p13, %p1710_p10 }
  0x3e   :  { %1584 = vmatpush3.bf16.msra.mxu0 %v1573_v3  ;;  %1588 = vmatpush3.bf16.msra.mxu1 %v1573_v3 }
  0x3f   :  { %1479 = vmatprep.mubr.msk.f32.mxu0 %vm76_vm0, %v60_v7  ;;  %1486 = vmatprep.mubr.msk.f32.mxu1 %vm76_vm0, %v62_v8 }
  0x40   :  { %1590 = vmatprep.subr.bf16.mxu0 %v1573_v3  ;;  %1594 = vmatprep.subr.bf16.mxu1 %v1573_v3 }
  0x41   :  { %1480 = vmatmul.mubr.msk.f32.vlgmr.msra.gmra.mrb[2].mxu0 %vm76_vm0, %v61_v9  ;;  %1487 = vmatmul.mubr.msk.f32.vlgmr.msra.gmra.mrb[2].mxu1 %vm76_vm0, %v63_v10 }
  0x42   :  { %1592 = vmatpush3.bf16.msra.mxu0 %v1573_v3  ;;  %1596 = vmatpush3.bf16.msra.mxu1 %v1573_v3 }
  0x43   :  { %1493 = vmatprep.mubr.msk.f32.mxu0 %vm76_vm0, %v64_v11  ;;  %1500 = vmatprep.mubr.msk.f32.mxu1 %vm76_vm0, %v66_v12 }
  0x44   :  { %1598 = vmatprep.subr.bf16.mxu0 %v1573_v3  ;;  %1602 = vmatprep.subr.bf16.mxu1 %v1573_v3 }
  0x45   :  { %1494 = vmatmul.mubr.msk.f32.vlgmr.msra.gmra.mrb[4].mxu0 %vm76_vm0, %v65_v13  ;;  %1501 = vmatmul.mubr.msk.f32.vlgmr.msra.gmra.mrb[4].mxu1 %vm76_vm0, %v67_v14 }
  0x46   :  { %1600 = vmatpush3.bf16.msra.mxu0 %v1573_v3  ;;  %1604 = vmatpush3.bf16.msra.mxu1 %v1573_v3 }
  0x47   :  { %1507 = vmatprep.mubr.msk.f32.mxu0 %vm76_vm0, %v68_v15  ;;  %1514 = vmatprep.mubr.msk.f32.mxu1 %vm76_vm0, %v70_v16 }
  0x49   :  { %1508 = vmatmul.mubr.msk.f32.vlgmr.msra.gmra.mrb[6].mxu0 %vm76_vm0, %v69_v17  ;;  %1515 = vmatmul.mubr.msk.f32.vlgmr.msra.gmra.mrb[6].mxu1 %vm76_vm0, %v71_v18 }
  0x4a   :  { %1521 = vmatprep.mubr.msk.f32.mxu0 %vm76_vm0, %v72_v19  ;;  %1528 = vmatprep.mubr.msk.f32.mxu1 %vm76_vm0, %v72_v19 }
 0x110   :  { %v1467_v20 = vpop.f32.mrb[0].mxu0  ;;  %v1474_v21 = vpop.f32.mrb[0].mxu1 }
 0x111   :  { %v149_v22 = vpop.f32.mrb[1].mxu0  ;;  %v230_v23 = vpop.f32.mrb[1].mxu1 }
 0x112   :  { %v1605_v24 = vpack.c.bf16 %v1467_v20, %v149_v22  ;;  %v1609_v25 = vpack.c.bf16 %v1474_v21, %v230_v23 }
 0x114   :  { %v1481_v26 = vpop.f32.mrb[2].mxu0  ;;  %v1488_v27 = vpop.f32.mrb[2].mxu1  ;;  %1606 = vmatprep.subr.bf16.mxu0 %v1605_v24  ;;  %1610 = vmatprep.subr.bf16.mxu1 %v1609_v25 }
 0x115   :  { %v311_v28 = vpop.f32.mrb[3].mxu0  ;;  %v392_v29 = vpop.f32.mrb[3].mxu1  ;;  %1608 = vmatpush3.bf16.msra.mxu0 %v1605_v24  ;;  %1612 = vmatpush3.bf16.msra.mxu1 %v1609_v25 }
 0x116   :  { %v1613_v31 = vpack.c.bf16 %v1481_v26, %v311_v28  ;;  %v1617_v32 = vpack.c.bf16 %v1488_v27, %v392_v29 }
 0x118   :  { %v1495_v33 = vpop.f32.mrb[4].mxu0  ;;  %v1502_v34 = vpop.f32.mrb[4].mxu1  ;;  %1522 = vmatmul.mubr.msk.f32.vlgmr.msra.gmra.mrb[8].mxu0 %vm76_vm0, %v73_v30  ;;  %1529 = vmatmul.mubr.msk.f32.vlgmr.msra.gmra.mrb[8].mxu1 %vm76_vm0, %v73_v30 }
 0x119   :  { %1614 = vmatprep.subr.bf16.mxu0 %v1613_v31  ;;  %1618 = vmatprep.subr.bf16.mxu1 %v1617_v32  ;;  %v473_v35 = vpop.f32.mrb[5].mxu0  ;;  %v554_v36 = vpop.f32.mrb[5].mxu1 }
 0x11a   :  { %v1621_v37 = vpack.c.bf16 %v1495_v33, %v473_v35  ;;  %v1625_v38 = vpack.c.bf16 %v1502_v34, %v554_v36  ;;  %1616 = vmatpush3.bf16.msra.mxu0 %v1613_v31  ;;  %1620 = vmatpush3.bf16.msra.mxu1 %v1617_v32 }
 0x11b   :  { %1535 = vmatprep.mubr.msk.f32.mxu0 %vm76_vm0, %v72_v19  ;;  %1542 = vmatprep.mubr.msk.f32.mxu1 %vm76_vm0, %v72_v19 }
 0x11c   :  { %v1509_v39 = vpop.f32.mrb[6].mxu0  ;;  %v1516_v40 = vpop.f32.mrb[6].mxu1  ;;  %1622 = vmatprep.subr.bf16.mxu0 %v1621_v37  ;;  %1626 = vmatprep.subr.bf16.mxu1 %v1625_v38 }
 0x11d   :  { %1536 = vmatmul.mubr.msk.f32.vlgmr.msra.gmra.mrb[10].mxu0 %vm76_vm0, %v73_v30  ;;  %1543 = vmatmul.mubr.msk.f32.vlgmr.msra.gmra.mrb[10].mxu1 %vm76_vm0, %v73_v30  ;;  %v635_v41 = vpop.f32.mrb[7].mxu0  ;;  %v716_v42 = vpop.f32.mrb[7].mxu1 }
 0x11e   :  { %v1629_v43 = vpack.c.bf16 %v1509_v39, %v635_v41  ;;  %v1633_v44 = vpack.c.bf16 %v1516_v40, %v716_v42  ;;  %1624 = vmatpush3.bf16.msra.mxu0 %v1621_v37  ;;  %1628 = vmatpush3.bf16.msra.mxu1 %v1625_v38 }
 0x11f   :  { %1549 = vmatprep.mubr.msk.f32.mxu0 %vm76_vm0, %v72_v19  ;;  %1556 = vmatprep.mubr.msk.f32.mxu1 %vm76_vm0, %v72_v19 }
 0x120   :  { %1630 = vmatprep.subr.bf16.mxu0 %v1629_v43  ;;  %1634 = vmatprep.subr.bf16.mxu1 %v1633_v44 }
 0x121   :  { %1550 = vmatmul.mubr.msk.f32.vlgmr.msra.gmra.mrb[12].mxu0 %vm76_vm0, %v73_v30  ;;  %1557 = vmatmul.mubr.msk.f32.vlgmr.msra.gmra.mrb[12].mxu1 %vm76_vm0, %v73_v30 }
 0x122   :  { %1632 = vmatpush3.bf16.msra.mxu0 %v1629_v43  ;;  %1636 = vmatpush3.bf16.msra.mxu1 %v1633_v44 }
 0x123   :  { %1563 = vmatprep.mubr.msk.f32.mxu0 %vm76_vm0, %v72_v19  ;;  %1570 = vmatprep.mubr.msk.f32.mxu1 %vm76_vm0, %v72_v19 }
 0x125   :  { %1564 = vmatmul.mubr.msk.f32.vlgmr.msra.gmra.mrb[14].mxu0 %vm76_vm0, %v73_v30  ;;  %1571 = vmatmul.mubr.msk.f32.vlgmr.msra.gmra.mrb[14].mxu1 %vm76_vm0, %v73_v30 }
 0x1eb   :  { %v1523_v45 = vpop.f32.mrb[8].mxu0  ;;  %v1530_v46 = vpop.f32.mrb[8].mxu1 }
 0x1ec   :  { %1332 = vst.msk [vmem:[#allocation8 + $0x8] sm:$0xff] %vm76_vm0, %v1523_v45  ;;  %1334 = vst.msk [vmem:[#allocation8 + $0x18] sm:$0xff] %vm76_vm0, %v1530_v46  ;;  %v797_v47 = vpop.f32.mrb[9].mxu0  ;;  %v872_v48 = vpop.f32.mrb[9].mxu1 }
 0x1ed   :  { %1331 = vst.msk [vmem:[#allocation8] sm:$0xff] %vm76_vm0, %v797_v47  ;;  %1333 = vst.msk [vmem:[#allocation8 + $0x10] sm:$0xff] %vm76_vm0, %v872_v48 }
 0x1f0   :  { %v1537_v49 = vpop.f32.mrb[10].mxu0  ;;  %v1544_v50 = vpop.f32.mrb[10].mxu1 }
 0x1f1   :  { %1336 = vst.msk [vmem:[#allocation8 + $0x28] sm:$0xff] %vm76_vm0, %v1537_v49  ;;  %1338 = vst.msk [vmem:[#allocation8 + $0x38] sm:$0xff] %vm76_vm0, %v1544_v50  ;;  %v947_v51 = vpop.f32.mrb[11].mxu0  ;;  %v1022_v52 = vpop.f32.mrb[11].mxu1 }
 0x1f2   :  { %1335 = vst.msk [vmem:[#allocation8 + $0x20] sm:$0xff] %vm76_vm0, %v947_v51  ;;  %1337 = vst.msk [vmem:[#allocation8 + $0x30] sm:$0xff] %vm76_vm0, %v1022_v52 }
 0x1f4   :  { %v1551_v53 = vpop.f32.mrb[12].mxu0  ;;  %v1558_v54 = vpop.f32.mrb[12].mxu1 }
 0x1f5   :  { %1340 = vst.msk [vmem:[#allocation8 + $0x48] sm:$0xff] %vm76_vm0, %v1551_v53  ;;  %1342 = vst.msk [vmem:[#allocation8 + $0x58] sm:$0xff] %vm76_vm0, %v1558_v54  ;;  %v1097_v55 = vpop.f32.mrb[13].mxu0  ;;  %v1172_v56 = vpop.f32.mrb[13].mxu1 }
 0x1f6   :  { %1339 = vst.msk [vmem:[#allocation8 + $0x40] sm:$0xff] %vm76_vm0, %v1097_v55  ;;  %1341 = vst.msk [vmem:[#allocation8 + $0x50] sm:$0xff] %vm76_vm0, %v1172_v56 }
 0x1f8   :  { %v1565_v57 = vpop.f32.mrb[14].mxu0  ;;  %v1572_v58 = vpop.f32.mrb[14].mxu1 }
 0x1f9   :  { %1344 = vst.msk [vmem:[#allocation8 + $0x68] sm:$0xff] %vm76_vm0, %v1565_v57  ;;  %1346 = vst.msk [vmem:[#allocation8 + $0x78] sm:$0xff] %vm76_vm0, %v1572_v58  ;;  %v1247_v59 = vpop.f32.mrb[15].mxu0  ;;  %v1322_v60 = vpop.f32.mrb[15].mxu1 }
 0x1fa   :  { %1343 = vst.msk [vmem:[#allocation8 + $0x60] sm:$0xff] %vm76_vm0, %v1247_v59  ;;  %1345 = vst.msk [vmem:[#allocation8 + $0x70] sm:$0xff] %vm76_vm0, %v1322_v60 }
 0x1fb   :  { %1720 = shalt.err (!%p1717_p0)
}
 0x1fc   :  { %s1721_s27 = scalar_lea.hbm %s1881_s3, 2048 }
 0x1fd   :  { %p1722_p1 = scmp.ne.s32.totalorder %s1881_s3, %s1721_s27  ;;  %p1725_p2 = scmp.lt.u32.totalorder %s1721_s27, %s1881_s3 }
 0x1ff   :  { %p1727_p3 = pnand %p1725_p2, %p1722_p1 }
 0x201   :  { %1730 = shalt.err (!%p1727_p3)
}
 0x202   :  { %1358 = dma.vmem_to_hbm [thread:$0]  %s1353_s21, 2048, %s1881_s3, [#allocation4], %s1739_s24, %s1739_s24, %s1740_s25  }
 0x203   :  { %1735 = dma.done.wait [#allocation4], 2048  }
 0x204   :  { %1736 = vsyncadd [#allocation4], 4294965248 }
 0x205   :  { %1362 = vsyncpa [#allocation3], 1 }
 0x206   :  { %1363 = vsyncpa [#allocation6], 1 }
 0x207   :  { %1364 = vsyncpa [#allocation4], 1 }

</bundles_post_ra>
